<compile_context>
chip_gen: v5e
topology: v5e:2x2
jax: 0.10.0
libtpu: 0.0.40
codegen_flags: <defaults>
</compile_context>

<pallas_src>
import math

import jax
import jax.numpy as jnp
from jax.experimental import pallas as pl
from jax.experimental.pallas import tpu as pltpu


def _round_up(x, mult):
    return ((x + mult - 1) // mult) * mult


def _make_cosface_kernel(s, m, tn):
    s = float(s)
    sm = float(s) * float(m)

    def kernel(x_ref, wt_ref, rowscale_ref, label_ref, out_ref, inv_wn_ref):
        # x_ref:        [TM, D]  input tile (MXU operand dtype)
        # wt_ref:       [D, TN]  pre-transposed weight tile (MXU operand dtype)
        # rowscale_ref: [TM, 1]  f32, s / ||x_row|| (precomputed in wrapper)
        # label_ref:    [TM, 1]  int32 labels for this batch tile
        # out_ref:      [TM, TN] logits tile
        # inv_wn_ref:   [1, TN]  f32 scratch: 1 / ||w_col||, persists across the
        #                        inner batch axis (recomputed when the class
        #                        tile changes, i.e. at inner index 0).
        @pl.when(pl.program_id(1) == 0)
        def _():
            w32 = wt_ref[...].astype(jnp.float32)
            inv_wn_ref[...] = jax.lax.rsqrt(
                jnp.maximum(jnp.sum(w32 * w32, axis=0, keepdims=True),
                            jnp.float32(1e-24)))

        # Raw (un-normalized) matmul on the MXU with f32 accumulation.
        raw = jnp.dot(x_ref[...], wt_ref[...],
                      preferred_element_type=jnp.float32)          # [TM, TN]

        # s * cosine = raw * (s / ||x_row||) * (1 / ||w_col||)
        cos_s = raw * rowscale_ref[...] * inv_wn_ref[...]

        # Margin via a single select against the label (no one_hot build).
        tm_, tn_ = out_ref.shape
        col0 = pl.program_id(0) * tn
        class_ids = col0 + jax.lax.broadcasted_iota(jnp.int32, (tm_, tn_), 1)
        out_ref[...] = jnp.where(class_ids == label_ref[...],
                                 cos_s - jnp.float32(sm),
                                 cos_s).astype(out_ref.dtype)

    return kernel


def _vmem_estimate(tm, tn, D, op_sz, out_sz):
    """Rough VMEM footprint: double-buffered I/O tiles + scratch + f32 temps."""
    io = 2 * (tm * D * op_sz          # x tile
              + D * tn * op_sz        # W^T tile
              + tm * 4                # rowscale tile (f32)
              + tm * 4                # label tile (i32)
              + tm * tn * out_sz)     # output tile
    scratch = tn * 4                  # inv_wn
    interm = 3 * tm * tn * 4 + D * tn * 4   # raw/cos_s/class_ids + w32 cast
    return io + scratch + interm


def cosface_forward(x, weight, label, s=30.0, m=0.3,
                    out_dtype=None, tm=None, tn=None, mxu_dtype=None):
    """CosFace logits.

    x:         [B, D]  (f32 or bf16)
    weight:    [C, D]  (same layout as the PyTorch Parameter)
    label:     [B]     int
    mxu_dtype: dtype fed to the MXU (e.g. jnp.bfloat16 on v6e/v7x); defaults to
               the promoted input dtype (bit-faithful to the f32 reference).
    returns    [B, C] logits in `out_dtype` (defaults to x.dtype).
    """
    B, D = x.shape
    C, Dw = weight.shape
    assert D == Dw, "feature dims must match"
    out_dtype = out_dtype or x.dtype
    mxu_dtype = mxu_dtype or jnp.promote_types(x.dtype, weight.dtype)

    # Tile sizes: lane-dense class tiles (multiple of 128), batch tiles a
    # multiple of 8 sublanes.  Large defaults amortize per-grid-step overhead.
    if tn is None:
        tn = min(1024, _round_up(C, 128))
    tn = min(_round_up(tn, 128), _round_up(C, 128))
    if tm is None:
        tm = min(512, _round_up(B, 8))
    tm = min(_round_up(tm, 8), _round_up(B, 8))

    # VMEM budget: ~75% of the chip's physical VMEM (64 MiB on v7x, 128 MiB on
    # v5e/v6e); fall back to the v7x-safe value if the query is unavailable.
    try:
        vmem_cap = int(pltpu.get_tpu_info().vmem_capacity_bytes)
    except Exception:
        vmem_cap = 64 << 20
    vmem_budget = int(vmem_cap * 0.75)

    op_sz = jnp.dtype(mxu_dtype).itemsize
    out_sz = jnp.dtype(out_dtype).itemsize
    # Shrink tiles until the (intermediate-inclusive) estimate fits the budget.
    while (_vmem_estimate(tm, tn, D, op_sz, out_sz) > vmem_budget
           and (tn > 128 or tm > 8)):
        if tn > 128:
            tn = max(128, _round_up(tn // 2, 128))
        else:
            tm = max(8, _round_up(tm // 2, 8))
    est = _vmem_estimate(tm, tn, D, op_sz, out_sz)
    vmem_limit = min(max(int(est * 1.25) + (4 << 20), 32 << 20), vmem_budget)

    Bp = _round_up(B, tm)
    Cp = _round_up(C, tn)

    # Precompute the row scale s / ||x_row|| once (f32), matching
    # F.normalize's eps clamp.  Padded rows are all-zero -> finite scale, and
    # raw == 0 there anyway.
    x32 = x.astype(jnp.float32)
    rowscale = jnp.float32(s) * jax.lax.rsqrt(
        jnp.maximum(jnp.sum(x32 * x32, axis=1, keepdims=True),
                    jnp.float32(1e-24)))                         # [B, 1]

    xp = x.astype(mxu_dtype)
    if Bp != B:
        xp = jnp.pad(xp, ((0, Bp - B), (0, 0)))
        rowscale = jnp.pad(rowscale, ((0, Bp - B), (0, 0)))
    w_t = weight.astype(mxu_dtype).T                              # [D, C]
    if Cp != C:
        w_t = jnp.pad(w_t, ((0, 0), (0, Cp - C)))
    label2d = label.reshape(B, 1).astype(jnp.int32)
    if Bp != B:
        label2d = jnp.pad(label2d, ((0, Bp - B), (0, 0)), constant_values=-1)

    n_c = Cp // tn
    n_b = Bp // tm

    kernel = _make_cosface_kernel(s, m, tn)

    out = pl.pallas_call(
        kernel,
        out_shape=jax.ShapeDtypeStruct((Bp, Cp), out_dtype),
        grid_spec=pltpu.PrefetchScalarGridSpec(
            num_scalar_prefetch=0,
            # class tiles outer, batch tiles inner -> each W^T tile is DMA'd
            # exactly once and stays resident across the inner batch axis.
            grid=(n_c, n_b),
            in_specs=[
                pl.BlockSpec((tm, D), lambda i, j: (j, 0)),   # x tile
                # If profiling shows exposed DMA at class-tile transitions
                # (small n_b), add pipeline_mode=pl.Buffered(3) here.
                pl.BlockSpec((D, tn), lambda i, j: (0, i)),   # W^T tile
                pl.BlockSpec((tm, 1), lambda i, j: (j, 0)),   # s/||x|| rows
                pl.BlockSpec((tm, 1), lambda i, j: (j, 0)),   # labels
            ],
            out_specs=pl.BlockSpec((tm, tn), lambda i, j: (j, i)),
            scratch_shapes=[pltpu.VMEM((1, tn), jnp.float32)],
        ),
        compiler_params=pltpu.CompilerParams(
            # Pin megacore sharding to the class axis (v7x) so W is streamed 1x.
            dimension_semantics=("parallel", "arbitrary"),
            vmem_limit_bytes=vmem_limit,
        ),
    )(xp, w_t, rowscale, label2d)

    return out[:B, :C]


def _xavier_uniform(key, shape):
    # nn.init.xavier_uniform_ for a [out_features, in_features] matrix.
    fan_out, fan_in = shape
    bound = math.sqrt(6.0 / (fan_in + fan_out))
    return jax.random.uniform(key, shape, jnp.float32, -bound, bound)


def _reference(x, weight, label, s, m):
    xh = x / jnp.maximum(jnp.linalg.norm(x, axis=-1, keepdims=True), 1e-12)
    wh = weight / jnp.maximum(jnp.linalg.norm(weight, axis=-1, keepdims=True), 1e-12)
    cosine = xh @ wh.T
    one_hot = jax.nn.one_hot(label, weight.shape[0], dtype=jnp.float32)
    return s * (one_hot * (cosine - m) + (1.0 - one_hot) * cosine)


if __name__ == "__main__":
    S, M = 30.0, 0.3

    # --- Small test (module-consistent toy shapes) ---
    B, IN_FEATURES, OUT_FEATURES = 8, 32, 16
    key = jax.random.PRNGKey(0)
    kx, kw, kl, kx2, kw2, kl2 = jax.random.split(key, 6)

    x = jax.random.normal(kx, (B, IN_FEATURES), dtype=jnp.float32)
    weight = _xavier_uniform(kw, (OUT_FEATURES, IN_FEATURES))
    label = jax.random.randint(kl, (B,), 0, OUT_FEATURES, dtype=jnp.int32)

    out = jax.block_until_ready(cosface_forward(x, weight, label, s=S, m=M))
    ref = _reference(x, weight, label, S, M)
    assert out.shape == (B, OUT_FEATURES)
    assert jnp.allclose(out, ref, atol=1e-4, rtol=1e-4)

    # --- Multi-tile test: exercises class-tile offsets, batch tiling and
    #     class-dimension padding (C=300 -> padded to 384 with tn=128). ---
    B2, D2, C2 = 24, 128, 300
    x2 = jax.random.normal(kx2, (B2, D2), dtype=jnp.float32)
    w2 = _xavier_uniform(kw2, (C2, D2))
    l2 = jax.random.randint(kl2, (B2,), 0, C2, dtype=jnp.int32)

    out2 = jax.block_until_ready(
        cosface_forward(x2, w2, l2, s=S, m=M, tm=8, tn=128))
    ref2 = _reference(x2, w2, l2, S, M)
    assert out2.shape == (B2, C2)
    assert jnp.allclose(out2, ref2, atol=1e-4, rtol=1e-4)

    # --- Optional bf16-MXU path (v6e/v7x recommendation); small, deliberate
    #     numeric deviation from the f32 reference. ---
    out3 = jax.block_until_ready(
        cosface_forward(x2, w2, l2, s=S, m=M, mxu_dtype=jnp.bfloat16))
    assert out3.shape == (B2, C2)
    assert float(jnp.max(jnp.abs(out3.astype(jnp.float32) - ref2))) < 0.5

    print("KERNEL_OK")
</pallas_src>

<mosaic_0001>
module attributes {stable_mosaic.version = 11 : i64} {
  func.func @kernel(%arg0: i32, %arg1: i32, %arg2: memref<8x32xf32, #tpu.memory_space<vmem>>, %arg3: memref<32x128xf32, #tpu.memory_space<vmem>>, %arg4: memref<8x1xf32, #tpu.memory_space<vmem>>, %arg5: memref<8x1xi32, #tpu.memory_space<vmem>>, %arg6: memref<8x128xf32, #tpu.memory_space<vmem>>, %arg7: memref<1x128xf32, #tpu.memory_space<vmem>>) attributes {dimension_semantics = [#tpu.dimension_semantics<parallel>, #tpu.dimension_semantics<arbitrary>], iteration_bounds = array<i64: 1, 1>, scalar_prefetch = 0 : i64, scratch_operands = 1 : i64, tpu.core_type = #tpu.core_type<tc>, window_params = [{transform_indices = @transform_0, window_bounds = array<i64: 8, 32>}, {transform_indices = @transform_1, window_bounds = array<i64: 32, 128>}, {transform_indices = @transform_2, window_bounds = array<i64: 8, 1>}, {transform_indices = @transform_3, window_bounds = array<i64: 8, 1>}, {transform_indices = @transform_4, window_bounds = array<i64: 8, 128>}]} {
    %c0_i32 = arith.constant 0 : i32
    %0 = arith.cmpi eq, %arg1, %c0_i32 : i32
    %1 = arith.extui %0 : i1 to i32
    %c0_i32_0 = arith.constant 0 : i32
    %2 = arith.cmpi ne, %1, %c0_i32_0 : i32
    scf.if %2 {
      %c0_13 = arith.constant 0 : index
      %c0_14 = arith.constant 0 : index
      %23 = vector.load %arg3[%c0_13, %c0_14] : memref<32x128xf32, #tpu.memory_space<vmem>>, vector<32x128xf32>
      %24 = arith.mulf %23, %23 : vector<32x128xf32>
      %cst_15 = arith.constant dense<0.000000e+00> : vector<128xf32>
      %25 = vector.multi_reduction <add>, %24, %cst_15 [0] : vector<32x128xf32> to vector<128xf32>
      %26 = vector.shape_cast %25 : vector<128xf32> to vector<1x128xf32>
      %cst_16 = arith.constant 1.000000e-24 : f32
      %27 = vector.broadcast %cst_16 : f32 to vector<1x128xf32>
      %28 = arith.maximumf %26, %27 : vector<1x128xf32>
      %29 = math.rsqrt %28 : vector<1x128xf32>
      %c0_17 = arith.constant 0 : index
      %c0_18 = arith.constant 0 : index
      %30 = vector.load %arg7[%c0_17, %c0_18] : memref<1x128xf32, #tpu.memory_space<vmem>>, vector<1x128xf32>
      tpu.vector_store %arg7[%c0_17, %c0_18], %29 {strides = array<i32>} : memref<1x128xf32, #tpu.memory_space<vmem>>, vector<1x128xf32>,
    } else {
    }
    %c0 = arith.constant 0 : index
    %c0_1 = arith.constant 0 : index
    %3 = vector.load %arg2[%c0, %c0_1] : memref<8x32xf32, #tpu.memory_space<vmem>>, vector<8x32xf32>
    %c0_2 = arith.constant 0 : index
    %c0_3 = arith.constant 0 : index
    %4 = vector.load %arg3[%c0_2, %c0_3] : memref<32x128xf32, #tpu.memory_space<vmem>>, vector<32x128xf32>
    %cst = arith.constant dense<0.000000e+00> : vector<8x128xf32>
    %5 = tpu.matmul %3, %4, %cst {dimension_numbers = #tpu.dot_dimension_numbers<[1], [0], [0], [1], [0, 0, 1, 1], [], []>} : vector<8x32xf32>, vector<32x128xf32>, vector<8x128xf32> -> vector<8x128xf32>
    %c0_4 = arith.constant 0 : index
    %c0_5 = arith.constant 0 : index
    %6 = vector.load %arg4[%c0_4, %c0_5] : memref<8x1xf32, #tpu.memory_space<vmem>>, vector<8x1xf32>
    %7 = vector.broadcast %6 : vector<8x1xf32> to vector<8x128xf32>
    %8 = arith.mulf %5, %7 : vector<8x128xf32>
    %c0_6 = arith.constant 0 : index
    %c0_7 = arith.constant 0 : index
    %9 = vector.load %arg7[%c0_6, %c0_7] : memref<1x128xf32, #tpu.memory_space<vmem>>, vector<1x128xf32>
    %10 = vector.broadcast %9 : vector<1x128xf32> to vector<8x128xf32>
    %11 = arith.mulf %8, %10 : vector<8x128xf32>
    %c128_i32 = arith.constant 128 : i32
    %12 = arith.muli %arg0, %c128_i32 : i32
    %13 = tpu.iota {dimensions = array<i32: 1>} : vector<8x128xi32>
    %14 = vector.broadcast %12 : i32 to vector<8x128xi32>
    %15 = arith.addi %14, %13 : vector<8x128xi32>
    %c0_8 = arith.constant 0 : index
    %c0_9 = arith.constant 0 : index
    %16 = vector.load %arg5[%c0_8, %c0_9] : memref<8x1xi32, #tpu.memory_space<vmem>>, vector<8x1xi32>
    %17 = vector.broadcast %16 : vector<8x1xi32> to vector<8x128xi32>
    %18 = arith.cmpi eq, %15, %17 : vector<8x128xi32>
    %cst_10 = arith.constant 9.000000e+00 : f32
    %19 = vector.broadcast %cst_10 : f32 to vector<8x128xf32>
    %20 = arith.subf %11, %19 : vector<8x128xf32>
    %21 = arith.select %18, %20, %11 : vector<8x128xi1>, vector<8x128xf32>
    %c0_11 = arith.constant 0 : index
    %c0_12 = arith.constant 0 : index
    %22 = vector.load %arg6[%c0_11, %c0_12] : memref<8x128xf32, #tpu.memory_space<vmem>>, vector<8x128xf32>
    tpu.vector_store %arg6[%c0_11, %c0_12], %21 {strides = array<i32>} : memref<8x128xf32, #tpu.memory_space<vmem>>, vector<8x128xf32>,
    return
  }
  func.func @transform_0(%arg0: i32, %arg1: i32) -> (i32, i32) {
    %c0_i32 = arith.constant 0 : i32
    %c0_i32_0 = arith.constant 0 : i32
    return %arg1, %c0_i32 : i32, i32
  }
  func.func @transform_1(%arg0: i32, %arg1: i32) -> (i32, i32) {
    %c0_i32 = arith.constant 0 : i32
    %c0_i32_0 = arith.constant 0 : i32
    return %c0_i32, %arg0 : i32, i32
  }
  func.func @transform_2(%arg0: i32, %arg1: i32) -> (i32, i32) {
    %c0_i32 = arith.constant 0 : i32
    %c0_i32_0 = arith.constant 0 : i32
    return %arg1, %c0_i32 : i32, i32
  }
  func.func @transform_3(%arg0: i32, %arg1: i32) -> (i32, i32) {
    %c0_i32 = arith.constant 0 : i32
    %c0_i32_0 = arith.constant 0 : i32
    return %arg1, %c0_i32 : i32, i32
  }
  func.func @transform_4(%arg0: i32, %arg1: i32) -> (i32, i32) {
    %c0_i32 = arith.constant 0 : i32
    return %arg1, %arg0 : i32, i32
  }
}

</mosaic_0001>

<bundles_post_ra>
// kernel: tpu_custom_call.1
= control target key start
LH: loop header
LB: loop body
LE: loop exit
PB: predicated region body
PF: predicated region fallthrough
CT: control target
= control target key end

     0   :  { %9 = vsyncpa [#allocation4], 0  ;;  %s246_s0 = inlined_call_operand.vmem [shape: f32[8,32], index: 0, kind: input, shape index: {}]   ;;  %s247_s1 = inlined_call_operand.hbm [shape: f32[32,128], index: 1, kind: input, shape index: {}]   ;;  %s248_s2 = inlined_call_operand.vmem [shape: f32[8,1], index: 2, kind: input, shape index: {}]   ;;  %s249_s3 = inlined_call_operand.vmem [shape: s32[8,1], index: 3, kind: input, shape index: {}]   ;;  %s250_s4 = inlined_call_operand.hbm [shape: f32[8,128], index: 4, kind: output, shape index: {}]  }
   0x1   :  { %10 = vsyncpa [#allocation5], 0  ;;  %s17_s17 = sshll.u32 %s247_s1, 4  ;;  %s201_s18 = smov [#allocation3]   ;;  %s18_s17 = int_to_ptr.hbm [resolvable:$true] %s17_s17 }
   0x2   :  { %s19_s19 = sshll.u32 %s201_s18, 4  ;;  %s202_s20 = smov 128   ;;  %s20_s19 = int_to_ptr.vmem [resolvable:$true] %s19_s19 }
   0x3   :  { %s203_s21 = smov 8  }
   0x4   :  { %25 = dma.hbm_to_vmem [thread:$0]  %s18_s17, 512, %s20_s19, [#allocation4], %s202_s20, %s202_s20, %s203_s21  }
   0x5   :  { %197 = dma.done.wait [#allocation4], 512  }
   0x6   :  { %198 = vsyncadd [#allocation4], 4294966784  ;;  %v204_v0 = vmov 0   ;;  %v71_v1 = vld [vmem:[#allocation3 + $0x18] sm:$0xff]  ;;  %v70_v2 = vld [vmem:[#allocation3 + $0x10] sm:$0xff]  ;;  %vm72_vm0 = vcmask 261120   ;;  %v109_v30 = vlaneseq }
   0x7   :  { %145 = vset.pattern.permute.xlu0 %v204_v0  ;;  %88 = vmatpush.msra.mxu0 %v71_v1  ;;  %v96_v3 = vld [vmem:[%s248_s2] sm:$0xff]  ;;  %v69_v4 = vld [vmem:[#allocation3 + $0x8] sm:$0xff]  ;;  %v44_v10 = vmul.f32 %v70_v2, %v70_v2  ;;  %v45_v12 = vmul.f32 %v71_v1, %v71_v1  ;;  %s128_s28 = sshll.u32 %s250_s4, 4  ;;  %s129_s28 = int_to_ptr.hbm [resolvable:$true] %s128_s28 }
   0x8   :  { %99 = vperm.xlu0 %145, %v96_v3   ;;  %v68_v5 = vld [vmem:[#allocation3] sm:$0xff]  ;;  %v43_v9 = vmul.f32 %v69_v4, %v69_v4  ;;  %v110_v34 = vand.u32 127, %v109_v30 }
   0x9   :  { %89 = vmatpush.msra.mxu0 %v70_v2  ;;  %v67_v6 = vld [vmem:[%s246_s0] sm:$0xff]  ;;  %v42_v8 = vmul.f32 %v68_v5, %v68_v5  ;;  %s205_s0 = smov [#allocation6]  }
   0xa   :  { %v113_v7 = vld [vmem:[%s249_s3] sm:$0xff]  ;;  %s126_s2 = sshll.u32 %s205_s0, 4  ;;  %s127_s2 = int_to_ptr.vmem [resolvable:$true] %s126_s2 }
   0xb   :  { %90 = vmatpush.msra.mxu0 %v69_v4  ;;  %v46_v11 = vadd.f32 %v43_v9, %v42_v8 }
   0xd   :  { %91 = vmatpush.msra.mxu0 %v68_v5  ;;  %v47_v13 = vadd.f32 %v46_v11, %v44_v10 }
   0xe   :  { %138 = vmatmul.msk.f32.vlgmr.msra.gmra.mxu0 %vm72_vm0, %v67_v6 }
   0xf   :  { %v48_v14 = vadd.f32 %v47_v13, %v45_v12 }
  0x10   :  { %115 = vperm.xlu0 %145, %v113_v7  }
  0x11   :  { %v49_v15 = vrot.slane %v48_v14, 4 }
  0x13   :  { %v50_v16 = vadd.f32 %v49_v15, %v48_v14 }
  0x15   :  { %v51_v17 = vrot.slane %v50_v16, 2 }
  0x17   :  { %v52_v18 = vadd.f32 %v51_v17, %v50_v16 }
  0x19   :  { %v53_v19 = vrot.slane %v52_v18, 1 }
  0x1b   :  { %v54_v20 = vadd.f32 %v53_v19, %v52_v18 }
  0x1d   :  { %v55_v21 = vmax.f32 %v54_v20, 1e-24 }
  0x1f   :  { %147 = vrsqrt.f32 %v55_v21  ;;  %vm62_vm1 = vweird.f32 %v55_v21 }
  0x25   :  { %v148_v22 = vpop.eup %147 }
  0x26   :  { %v57_v23 = vmul.f32 %v148_v22, %v55_v21  ;;  %vm63_vm2 = vweird.f32 %v148_v22 }
  0x27   :  { %vm64_vm3 = vmor %vm62_vm1, %vm63_vm2 }
  0x28   :  { %v58_v24 = vmul.f32 %v148_v22, %v57_v23 }
  0x2a   :  { %v59_v25 = vmul.f32 0.5, %v58_v24 }
  0x2c   :  { %v60_v26 = vsub.f32 1.5, %v59_v25 }
  0x2e   :  { %v61_v27 = vmul.f32 %v148_v22, %v60_v26 }
  0x30   :  { %v65_v28 = vsel %vm64_vm3, %v148_v22, %v61_v27 }
  0x31   :  { %66 = vst [vmem:[#allocation2] sm:$0x1] %v65_v28 }
  0x38   :  { %v146_v31 = vld [vmem:[#allocation2] ss:$0 sm:$0xff] }
  0x7a   :  { %v100_v29 = vpop.permute.xlu0 %99 }
  0x82   :  { %v116_v35 = vpop.permute.xlu0 %115 }
  0x83   :  { %vm117_vm4 = vcmp.eq.s32.totalorder %v110_v34, %v116_v35 }
  0x8b   :  { %v93_v32 = vpop.f32.mrf.mxu0 }
  0x8c   :  { %v102_v33 = vmul.f32 %v100_v29, %v93_v32 }
  0x8e   :  { %v107_v36 = vmul.f32 %v146_v31, %v102_v33 }
  0x90   :  { %v139_v37 = vadd.f32 -9.0, %v107_v36 }
  0x92   :  { %v119_v38 = vsel %vm117_vm4, %v139_v37, %v107_v36 }
  0x93   :  { %120 = vst [vmem:[#allocation6] sm:$0xff] %v119_v38 }
  0x94   :  { %131 = dma.vmem_to_hbm [thread:$0]  %s127_s2, 128, %s129_s28, [#allocation5]  }
  0x95   :  { %199 = dma.done.wait [#allocation5], 128  }
  0x96   :  { %200 = vsyncadd [#allocation5], 4294967168 }
  0x97   :  { %136 = vsyncpa [#allocation4], 1 }
  0x98   :  { %137 = vsyncpa [#allocation5], 1 }

</bundles_post_ra>
